<compile_context>
chip_gen: v7x
topology: tpu7x:2x2x1
jax: 0.10.0
libtpu: 0.0.40
codegen_flags: <defaults>
</compile_context>

<pallas_src>
import math

import jax
import jax.numpy as jnp
from jax import lax
from jax.experimental import pallas as pl
from jax.experimental.pallas import tpu as pltpu


def _i32(v):
    """Python int -> two's-complement int32 constant (handles >= 2**31)."""
    v &= 0xFFFFFFFF
    if v >= (1 << 31):
        v -= 1 << 32
    return v


_MIX_C1 = _i32(0x7FEB352D)   # "lowbias32" multipliers (good on sequential keys)
_MIX_C2 = _i32(0x846CA68B)
_SEED_C = _i32(0x9E3779B9)   # golden-ratio constant for seed mixing


def _shr(x, k):
    """Logical right shift of an int32 array by a constant k."""
    return lax.shift_right_logical(x, jnp.full(x.shape, k, x.dtype))


def _mix32(x):
    """xorshift-multiply integer hash (bijective mix of int32 counters)."""
    x = x ^ _shr(x, 16)
    x = x * _MIX_C1
    x = x ^ _shr(x, 15)
    x = x * _MIX_C2
    x = x ^ _shr(x, 16)
    return x


def _noise_layer_kernel(seed_ref, x_ref, scale_ref, o_ref):
    # seed_ref : (1,)      int32 scalar-prefetch (SMEM)
    # x_ref    : (TR, L)   activation tile (VMEM)
    # scale_ref: (TR, 1)   per-row (== per-channel) noise scale, float32
    # o_ref    : (TR, L)
    tr, l = x_ref.shape

    # Global element index of every element of this tile keys the generator,
    # so tiling / megacore sharding never replicates the noise pattern.
    row0 = pl.program_id(0) * tr
    rows = lax.broadcasted_iota(jnp.int32, (tr, l), 0) + row0
    cols = lax.broadcasted_iota(jnp.int32, (tr, l), 1)
    idx = rows * l + cols

    # Counter-based hash -> 32 well-mixed bits per element (seed-dependent).
    bits = _mix32(idx ^ (seed_ref[0] * _SEED_C))

    # Split into two 16-bit uniforms and apply Box-Muller:
    #   u1 in (0, 1] -> radius (16-bit resolution caps |z| at ~4.7 sigma)
    #   u2 in [0, 1) -> angle
    hi = _shr(bits, 16)
    lo = bits & 0xFFFF
    u1 = (hi.astype(jnp.float32) + 1.0) * (1.0 / 65536.0)
    u2 = lo.astype(jnp.float32) * (1.0 / 65536.0)
    r = jnp.sqrt(-2.0 * jnp.log(u1))
    noise = r * jnp.cos((2.0 * math.pi) * u2)

    out = x_ref[...].astype(jnp.float32) + noise * scale_ref[...]
    o_ref[...] = out.astype(o_ref.dtype)


def _pick_tile_rows(num_rows, num_lanes, itemsize):
    # ~1 MiB input blocks => with double-buffered in+out roughly 4-5 MiB VMEM,
    # comfortably inside the scoped defaults on v5e/v6e/v7x.
    target_bytes = 1 << 20
    tr = (target_bytes // max(1, num_lanes * itemsize)) // 8 * 8
    tr = max(8, tr)
    if tr >= num_rows:
        return num_rows          # single full block along rows (always legal)
    return tr                    # multiple of 8; ragged tail handled by Pallas


@jax.jit
def _noise_layer_fwd(x, noise_scale, seed_arr):
    B, C, H, W = x.shape
    R, L = B * C, H * W
    x2d = x.reshape(R, L)        # contiguous NCHW view -> free reshape
    scale2d = jnp.broadcast_to(
        noise_scale.astype(jnp.float32)[None, :], (B, C)).reshape(R, 1)

    tr = _pick_tile_rows(R, L, x.dtype.itemsize)
    grid = (pl.cdiv(R, tr),)

    nelem = R * L
    cost = pl.CostEstimate(
        flops=12 * nelem,
        transcendentals=3 * nelem,               # log, sqrt, cos per element
        bytes_accessed=2 * nelem * x.dtype.itemsize + R * 4,
    )

    out2d = pl.pallas_call(
        _noise_layer_kernel,
        out_shape=jax.ShapeDtypeStruct((R, L), x.dtype),
        grid_spec=pltpu.PrefetchScalarGridSpec(
            num_scalar_prefetch=1,
            grid=grid,
            in_specs=[pl.BlockSpec((tr, L), lambda i, seed: (i, 0)),
                      pl.BlockSpec((tr, 1), lambda i, seed: (i, 0))],
            out_specs=pl.BlockSpec((tr, L), lambda i, seed: (i, 0)),
        ),
        input_output_aliases={1: 0},             # x (index 1, after the seed) -> out
        cost_estimate=cost,
        compiler_params=pltpu.CompilerParams(
            dimension_semantics=("parallel",),   # tiles independent -> 2 TCs on v7x
        ),
    )(seed_arr, x2d, scale2d)
    return out2d.reshape(B, C, H, W)


def noise_layer(x, noise_scale, seed=0):
    """NoiseLayer.forward.  x: (B, C, H, W) NCHW, noise_scale: (C,).

    Like torch's randn, fresh noise per forward pass requires the caller to
    thread a new `seed` each step (the generator is deterministic in seed).
    """
    seed_arr = jnp.asarray([seed], dtype=jnp.int32)
    return _noise_layer_fwd(x, noise_scale, seed_arr)


if __name__ == "__main__":
    B, C, H, W = 2, 4, 16, 16
    key = jax.random.PRNGKey(0)
    kx, ks = jax.random.split(key)
    x = jax.random.normal(kx, (B, C, H, W), jnp.float32)
    # The PyTorch parameter initializes to zeros; use nonzero values so the
    # noise path is actually exercised.
    noise_scale = 0.1 + 0.1 * jax.random.uniform(ks, (C,), jnp.float32)

    out = jax.block_until_ready(noise_layer(x, noise_scale, seed=0))
    assert out.shape == (B, C, H, W), out.shape
    assert bool(jnp.all(jnp.isfinite(out)))

    # Zero scale -> identity (matches a freshly initialized PyTorch NoiseLayer).
    out0 = jax.block_until_ready(
        noise_layer(x, jnp.zeros((C,), jnp.float32), seed=0))
    assert bool(jnp.allclose(out0, x)), "zero-scale NoiseLayer must be identity"

    # Different seeds must produce different noise.
    out1 = jax.block_until_ready(noise_layer(x, noise_scale, seed=123))
    assert not bool(jnp.allclose(out1, out)), "seed must change the noise"

    # Distribution sanity: (out - x) / scale_c should be ~ N(0, 1) per channel.
    diff = (out - x) / noise_scale[None, :, None, None]
    mean = jnp.mean(diff)
    std = jnp.std(diff, axis=(0, 2, 3))
    assert bool(jnp.abs(mean) < 0.2), mean
    assert bool(jnp.all((std > 0.7) & (std < 1.3))), std

    print("KERNEL_OK")
</pallas_src>

<mosaic_0001>
module attributes {stable_mosaic.version = 11 : i64} {
  func.func @_noise_layer_kernel(%arg0: i32, %arg1: memref<1xi32, #tpu.memory_space<smem>>, %arg2: memref<8x256xf32, #tpu.memory_space<vmem>>, %arg3: memref<8x1xf32, #tpu.memory_space<vmem>>, %arg4: memref<8x256xf32, #tpu.memory_space<vmem>>) attributes {dimension_semantics = [#tpu.dimension_semantics<parallel>], iteration_bounds = array<i64: 1>, scalar_prefetch = 1 : i64, scratch_operands = 0 : i64, tpu.core_type = #tpu.core_type<tc>, window_params = [{transform_indices = @transform_0, window_bounds = array<i64: 8, 256>}, {transform_indices = @transform_1, window_bounds = array<i64: 8, 1>}, {transform_indices = @transform_2, window_bounds = array<i64: 8, 256>}]} {
    %c8_i32 = arith.constant 8 : i32
    %0 = arith.muli %arg0, %c8_i32 : i32
    %1 = tpu.iota {dimensions = array<i32: 0>} : vector<8x256xi32>
    %2 = vector.broadcast %0 : i32 to vector<8x256xi32>
    %3 = arith.addi %1, %2 : vector<8x256xi32>
    %4 = tpu.iota {dimensions = array<i32: 1>} : vector<8x256xi32>
    %c256_i32 = arith.constant 256 : i32
    %5 = vector.broadcast %c256_i32 : i32 to vector<8x256xi32>
    %6 = arith.muli %3, %5 : vector<8x256xi32>
    %7 = arith.addi %6, %4 : vector<8x256xi32>
    %c0 = arith.constant 0 : index
    %8 = memref.load %arg1[%c0] : memref<1xi32, #tpu.memory_space<smem>>
    %c-1640531527_i32 = arith.constant -1640531527 : i32
    %9 = arith.muli %8, %c-1640531527_i32 : i32
    %10 = vector.broadcast %9 : i32 to vector<8x256xi32>
    %11 = arith.xori %7, %10 : vector<8x256xi32>
    %c16_i32 = arith.constant 16 : i32
    %12 = vector.broadcast %c16_i32 : i32 to vector<8x256xi32>
    %13 = arith.shrui %11, %12 : vector<8x256xi32>
    %14 = arith.xori %11, %13 : vector<8x256xi32>
    %c2146121005_i32 = arith.constant 2146121005 : i32
    %15 = vector.broadcast %c2146121005_i32 : i32 to vector<8x256xi32>
    %16 = arith.muli %14, %15 : vector<8x256xi32>
    %c15_i32 = arith.constant 15 : i32
    %17 = vector.broadcast %c15_i32 : i32 to vector<8x256xi32>
    %18 = arith.shrui %16, %17 : vector<8x256xi32>
    %19 = arith.xori %16, %18 : vector<8x256xi32>
    %c-2073254261_i32 = arith.constant -2073254261 : i32
    %20 = vector.broadcast %c-2073254261_i32 : i32 to vector<8x256xi32>
    %21 = arith.muli %19, %20 : vector<8x256xi32>
    %c16_i32_0 = arith.constant 16 : i32
    %22 = vector.broadcast %c16_i32_0 : i32 to vector<8x256xi32>
    %23 = arith.shrui %21, %22 : vector<8x256xi32>
    %24 = arith.xori %21, %23 : vector<8x256xi32>
    %c16_i32_1 = arith.constant 16 : i32
    %25 = vector.broadcast %c16_i32_1 : i32 to vector<8x256xi32>
    %26 = arith.shrui %24, %25 : vector<8x256xi32>
    %c65535_i32 = arith.constant 65535 : i32
    %27 = vector.broadcast %c65535_i32 : i32 to vector<8x256xi32>
    %28 = arith.andi %24, %27 : vector<8x256xi32>
    %29 = arith.sitofp %26 : vector<8x256xi32> to vector<8x256xf32>
    %cst = arith.constant 1.000000e+00 : f32
    %30 = vector.broadcast %cst : f32 to vector<8x256xf32>
    %31 = arith.addf %29, %30 : vector<8x256xf32>
    %cst_2 = arith.constant 1.52587891E-5 : f32
    %32 = vector.broadcast %cst_2 : f32 to vector<8x256xf32>
    %33 = arith.mulf %31, %32 : vector<8x256xf32>
    %34 = arith.sitofp %28 : vector<8x256xi32> to vector<8x256xf32>
    %cst_3 = arith.constant 1.52587891E-5 : f32
    %35 = vector.broadcast %cst_3 : f32 to vector<8x256xf32>
    %36 = arith.mulf %34, %35 : vector<8x256xf32>
    %37 = math.log %33 : vector<8x256xf32>
    %cst_4 = arith.constant -2.000000e+00 : f32
    %38 = vector.broadcast %cst_4 : f32 to vector<8x256xf32>
    %39 = arith.mulf %38, %37 : vector<8x256xf32>
    %40 = math.sqrt %39 : vector<8x256xf32>
    %cst_5 = arith.constant 6.28318548 : f32
    %41 = vector.broadcast %cst_5 : f32 to vector<8x256xf32>
    %42 = arith.mulf %41, %36 : vector<8x256xf32>
    %43 = math.cos %42 : vector<8x256xf32>
    %44 = arith.mulf %40, %43 : vector<8x256xf32>
    %c0_6 = arith.constant 0 : index
    %c0_7 = arith.constant 0 : index
    %45 = vector.load %arg2[%c0_6, %c0_7] : memref<8x256xf32, #tpu.memory_space<vmem>>, vector<8x256xf32>
    %c0_8 = arith.constant 0 : index
    %c0_9 = arith.constant 0 : index
    %46 = vector.load %arg3[%c0_8, %c0_9] : memref<8x1xf32, #tpu.memory_space<vmem>>, vector<8x1xf32>
    %47 = vector.broadcast %46 : vector<8x1xf32> to vector<8x256xf32>
    %48 = arith.mulf %44, %47 : vector<8x256xf32>
    %49 = arith.addf %45, %48 : vector<8x256xf32>
    %c0_10 = arith.constant 0 : index
    %c0_11 = arith.constant 0 : index
    %50 = vector.load %arg4[%c0_10, %c0_11] : memref<8x256xf32, #tpu.memory_space<vmem>>, vector<8x256xf32>
    tpu.vector_store %arg4[%c0_10, %c0_11], %49 {strides = array<i32>} : memref<8x256xf32, #tpu.memory_space<vmem>>, vector<8x256xf32>,
    return
  }
  func.func @transform_0(%arg0: i32, %arg1: memref<1xi32, #tpu.memory_space<smem>>) -> (i32, i32) {
    %c0_i32 = arith.constant 0 : i32
    %c0_i32_0 = arith.constant 0 : i32
    return %arg0, %c0_i32 : i32, i32
  }
  func.func @transform_1(%arg0: i32, %arg1: memref<1xi32, #tpu.memory_space<smem>>) -> (i32, i32) {
    %c0_i32 = arith.constant 0 : i32
    %c0_i32_0 = arith.constant 0 : i32
    return %arg0, %c0_i32 : i32, i32
  }
  func.func @transform_2(%arg0: i32, %arg1: memref<1xi32, #tpu.memory_space<smem>>) -> (i32, i32) {
    %c0_i32 = arith.constant 0 : i32
    %c0_i32_0 = arith.constant 0 : i32
    return %arg0, %c0_i32 : i32, i32
  }
}

</mosaic_0001>

<bundles_post_ra>
// kernel: _noise_layer_fwd.1
= control target key start
LH: loop header
LB: loop body
LE: loop exit
PB: predicated region body
PF: predicated region fallthrough
CT: control target
= control target key end

     0   :  { %v14_v0 = vlaneseq  ;;  %v347_v1 = vmov 0   ;;  %v348_v49 = vmov 683565275   ;;  %v349_v51 = vmov 2475754826   ;;  %s485_s2 = inlined_call_operand.vmem [shape: f32[8,1], index: 2, kind: input, shape index: {}]   ;;  %s486_s0 = inlined_call_operand.<no memory space> [shape: s32[1], index: 0, kind: input, shape index: {}]   ;;  %s487_s1 = inlined_call_operand.vmem [shape: f32[8,256], index: 1, kind: input, shape index: {}, may-alias: {1,3}]   ;;  %s488_s3 = inlined_call_operand.vmem [shape: f32[8,256], index: 3, kind: output, shape index: {}, may-alias: {1,3}]  }
   0x1   :  { %330 = vset.pattern.permute.xlu0 %v347_v1  ;;  %v291_v2 = vld [vmem:[%s485_s2] sm:$0xff]  ;;  %s25_s16 = smul.u32 2654435769, %s486_s0  ;;  %v350_v56 = vmov 2131351028  }
   0x2   :  { %294 = vperm.xlu0 %330, %v291_v2   ;;  %v15_v3 = vshrl.u32 %v14_v0, 7  ;;  %v19_v4 = vand.u32 127, %v14_v0  ;;  %v351_v59 = vmov 2102212464   ;;  %v352_v62 = vmov 920167782  }
   0x3   :  { %v26_v7 = vstv %s25_s16 }
   0x4   :  { %v20_v5 = vadd.s32 128, %v19_v4  ;;  %v21_v6 = vmul.u32 256, %v15_v3 }
   0x6   :  { %v22_v8 = vadd.s32 %v21_v6, %v19_v4  ;;  %v23_v9 = vadd.s32 %v21_v6, %v20_v5  ;;  %v353_v5 = vmov 1326507024  }
   0x8   :  { %v27_v10 = vxor.u32 %v26_v7, %v22_v8  ;;  %v28_v11 = vxor.u32 %v26_v7, %v23_v9 }
   0xa   :  { %v29_v12 = vshrl.u32 %v27_v10, 16  ;;  %v30_v13 = vshrl.u32 %v28_v11, 16 }
   0xc   :  { %v31_v14 = vxor.u32 %v29_v12, %v27_v10  ;;  %v32_v15 = vxor.u32 %v30_v13, %v28_v11 }
   0xe   :  { %v33_v16 = vmul.u32 2146121005, %v31_v14  ;;  %v34_v17 = vmul.u32 2146121005, %v32_v15 }
  0x10   :  { %v35_v18 = vshrl.u32 %v33_v16, 15  ;;  %v36_v19 = vshrl.u32 %v34_v17, 15 }
  0x12   :  { %v37_v20 = vxor.u32 %v35_v18, %v33_v16  ;;  %v38_v21 = vxor.u32 %v36_v19, %v34_v17 }
  0x14   :  { %v39_v22 = vmul.u32 2221713035, %v37_v20  ;;  %v40_v23 = vmul.u32 2221713035, %v38_v21 }
  0x16   :  { %v41_v24 = vshrl.u32 %v39_v22, 16  ;;  %v42_v25 = vshrl.u32 %v40_v23, 16 }
  0x18   :  { %v380_v26 = vxor.u32 %v41_v24, %v39_v22  ;;  %v382_v27 = vxor.u32 %v42_v25, %v40_v23 }
  0x1a   :  { %v47_v28 = vand.u32 65535, %v380_v26  ;;  %v48_v29 = vand.u32 65535, %v382_v27 }
  0x1c   :  { %v55_v30 = vcvt.s32.f32 %v47_v28  ;;  %v56_v31 = vcvt.s32.f32 %v48_v29 }
  0x1e   :  { %v57_v32 = vmul.f32 1.5258789e-05, %v55_v30  ;;  %v58_v33 = vmul.f32 1.5258789e-05, %v56_v31 }
  0x20   :  { %v386_v34 = vmul.f32 6.2831855, %v57_v32  ;;  %v388_v35 = vmul.f32 6.2831855, %v58_v33 }
  0x22   :  { %v84_v36 = vand.u32 2139095040, %v386_v34  ;;  %v187_v38 = vand.u32 2139095040, %v388_v35  ;;  %v81_v41 = vand.u32 2147483647, %v386_v34  ;;  %v184_v8 = vand.u32 2147483647, %v388_v35 }
  0x23   :  { %vm83_vm13 = vcmp.lt.s32.totalorder %v386_v34, 0 }
  0x24   :  { %v85_v37 = vshrl.u32 %v84_v36, 23  ;;  %v188_v40 = vshrl.u32 %v187_v38, 23  ;;  %v88_v46 = vand.u32 8388607, %v81_v41  ;;  %v191_v24 = vand.u32 8388607, %v184_v8 }
  0x25   :  { %vm441_vm14 = vcmp.le.f32.partialorder %v81_v41, 0.7853982 }
  0x26   :  { %v307_v39 = vadd.s32 4294967169, %v85_v37  ;;  %v311_v43 = vadd.s32 4294967169, %v188_v40  ;;  %v89_v53 = vor.u32 8388608, %v88_v46  ;;  %v192_v46 = vor.u32 8388608, %v191_v24 }
  0x28   :  { %v91_v42 = vadd.s32 1, %v307_v39  ;;  %v194_v45 = vadd.s32 1, %v311_v43  ;;  %v129_v7 = vshll.u32 %v89_v53, 8 }
  0x2a   :  { %vm92_vm0 = vcmp.gt.s32.totalorder %v91_v42, 0  ;;  %vm195_vm1 = vcmp.gt.s32.totalorder %v194_v45, 0 }
  0x2b   :  { %v93_v44 = vsel %vm92_vm0, %v91_v42, 0  ;;  %v196_v0 = vsel %vm195_vm1, %v194_v45, 0  ;;  %vm186_vm0 = vcmp.lt.s32.totalorder %v388_v35, 0  ;;  %vm460_vm1 = vcmp.le.f32.partialorder %v184_v8, 0.7853982 }
  0x2c   :  { %v95_v47 = vand.u32 31, %v93_v44  ;;  %v94_v54 = vshrl.u32 %v93_v44, 5  ;;  %v198_v13 = vand.u32 31, %v196_v0  ;;  %v197_v42 = vshrl.u32 %v196_v0, 5 }
  0x2e   :  { %v96_v48 = vsub.s32 32, %v95_v47  ;;  %v98_v50 = vshll.u32 %v348_v49, %v95_v47  ;;  %v101_v52 = vshll.u32 %v349_v51, %v95_v47  ;;  %v104_v58 = vshll.u32 %v350_v56, %v95_v47 }
  0x2f   :  { %v107_v60 = vshll.u32 %v351_v59, %v95_v47  ;;  %v110_v63 = vshll.u32 %v352_v62, %v95_v47  ;;  %vm113_vm2 = vcmp.lt.s32.totalorder %v94_v54, 1  ;;  %vm115_vm3 = vcmp.lt.s32.totalorder %v94_v54, 3 }
  0x30   :  { %v99_v55 = vshrl.u32 %v349_v51, %v96_v48  ;;  %v102_v57 = vshrl.u32 %v350_v56, %v96_v48  ;;  %v97_v61 = vshrl.u32 %v348_v49, %v96_v48  ;;  %v105_v3 = vshrl.u32 %v351_v59, %v96_v48 }
  0x31   :  { %v108_v4 = vshrl.u32 %v352_v62, %v96_v48  ;;  %v111_v6 = vshrl.u32 %v353_v5, %v96_v48  ;;  %vm116_vm4 = vcmp.lt.s32.totalorder %v94_v54, 4  ;;  %vm114_vm5 = vcmp.lt.s32.totalorder %v94_v54, 2 }
  0x32   :  { %v100_v1 = vor.u32 %v99_v55, %v98_v50  ;;  %v103_v2 = vor.u32 %v102_v57, %v101_v52  ;;  %v106_v9 = vor.u32 %v105_v3, %v104_v58  ;;  %v199_v21 = vsub.s32 32, %v198_v13 }
  0x33   :  { %v109_v10 = vor.u32 %v108_v4, %v107_v60  ;;  %v112_v11 = vor.u32 %v111_v6, %v110_v63  ;;  %v201_v33 = vshll.u32 %v348_v49, %v198_v13  ;;  %v204_v37 = vshll.u32 %v349_v51, %v198_v13 }
  0x34   :  { %v121_v12 = vsel %vm113_vm2, %v100_v1, %v103_v2  ;;  %v117_v14 = vsel %vm113_vm2, %v97_v61, %v100_v1  ;;  %v118_v15 = vsel %vm116_vm4, %v106_v9, 2102212464  ;;  %v125_v17 = vsel %vm113_vm2, %v103_v2, %v106_v9 }
  0x35   :  { %v122_v16 = vsel %vm116_vm4, %v109_v10, 920167782  ;;  %v119_v18 = vsel %vm115_vm3, %v103_v2, %v118_v15  ;;  %v126_v20 = vsel %vm116_vm4, %v112_v11, 1326507024  ;;  %v202_v36 = vshrl.u32 %v349_v51, %v199_v21 }
  0x36   :  { %v123_v19 = vsel %vm115_vm3, %v106_v9, %v122_v16  ;;  %v127_v23 = vsel %vm115_vm3, %v109_v10, %v126_v20  ;;  %v120_v25 = vsel %vm114_vm5, %v117_v14, %v119_v18  ;;  %v205_v38 = vshrl.u32 %v350_v56, %v199_v21 }
  0x37   :  { %v124_v22 = vsel %vm114_vm5, %v121_v12, %v123_v19  ;;  %v128_v28 = vsel %vm114_vm5, %v125_v17, %v127_v23  ;;  %v207_v39 = vshll.u32 %v350_v56, %v198_v13  ;;  %v136_v40 = vmul.u32 %v129_v7, %v120_v25 }
  0x38   :  { %v400_v29 = vmul.u32.u64.low %v129_v7, %v124_v22  ;;  %v401_v30 = vmul.u32.u64.high %v129_v7, %v124_v22, %v400_v29  ;;  %v404_v31 = vmul.u32.u64.low %v129_v7, %v128_v28  ;;  %v405_v32 = vmul.u32.u64.high %v129_v7, %v128_v28, %v404_v31 }
  0x39   :  { %v208_v43 = vshrl.u32 %v351_v59, %v199_v21  ;;  %v210_v44 = vshll.u32 %v351_v59, %v198_v13  ;;  %v211_v47 = vshrl.u32 %v352_v62, %v199_v21  ;;  %v45_v48 = vshrl.u32 %v380_v26, 16 }
  0x3a   :  { %v139_v45 = vadd.s32 1, %v401_v30  ;;  %vm138_vm6 = vc.u32 %v405_v32, %v400_v29  ;;  %v203_v50 = vor.u32 %v202_v36, %v201_v33  ;;  %v206_v52 = vor.u32 %v205_v38, %v204_v37 }
  0x3b   :  { %v200_v51 = vshrl.u32 %v348_v49, %v199_v21  ;;  %v209_v54 = vor.u32 %v208_v43, %v207_v39  ;;  %v212_v55 = vor.u32 %v211_v47, %v210_v44  ;;  %v213_v57 = vshll.u32 %v352_v62, %v198_v13 }
  0x3c   :  { %v140_v53 = vsel %vm138_vm6, %v139_v45, %v401_v30  ;;  %v214_v58 = vshrl.u32 %v353_v5, %v199_v21  ;;  %vm216_vm7 = vcmp.lt.s32.totalorder %v197_v42, 1  ;;  %vm217_vm8 = vcmp.lt.s32.totalorder %v197_v42, 2 }
  0x3d   :  { %v141_v56 = vadd.s32 %v140_v53, %v136_v40  ;;  %vm218_vm9 = vcmp.lt.s32.totalorder %v197_v42, 3  ;;  %vm219_vm10 = vcmp.lt.s32.totalorder %v197_v42, 4  ;;  %v232_v59 = vshll.u32 %v192_v46, 8 }
  0x3e   :  { %v215_v60 = vor.u32 %v214_v58, %v213_v57  ;;  %v221_v61 = vsel %vm219_vm10, %v209_v54, 2102212464  ;;  %v224_v63 = vsel %vm216_vm7, %v203_v50, %v206_v52  ;;  %v220_v0 = vsel %vm216_vm7, %v200_v51, %v203_v50 }
  0x3f   :  { %v142_v26 = vadd.s32 536870912, %v141_v56  ;;  %v222_v1 = vsel %vm218_vm9, %v206_v52, %v221_v61  ;;  %v225_v2 = vsel %vm219_vm10, %v212_v55, 920167782  ;;  %v228_v3 = vsel %vm216_vm7, %v206_v52, %v209_v54 }
  0x40   :  { %v49_v49 = vcvt.s32.f32 %v45_v48  ;;  %v226_v62 = vsel %vm218_vm9, %v209_v54, %v225_v2  ;;  %v229_v5 = vsel %vm219_vm10, %v215_v60, 1326507024  ;;  %v46_v9 = vshrl.u32 %v382_v27, 16 }
  0x41   :  { %v415_v4 = vshrl.u32 %v142_v26, 30  ;;  %v227_v6 = vsel %vm217_vm8, %v224_v63, %v226_v62  ;;  %v230_v7 = vsel %vm218_vm9, %v212_v55, %v229_v5  ;;  %v223_v11 = vsel %vm217_vm8, %v220_v0, %v222_v1 }
  0x42   :  { %v231_v12 = vsel %vm217_vm8, %v228_v3, %v230_v7  ;;  %v427_v15 = vmul.u32.u64.low %v232_v59, %v227_v6  ;;  %v428_v16 = vmul.u32.u64.high %v232_v59, %v227_v6, %v427_v15  ;;  %v51_v17 = vadd.f32 1.0, %v49_v49 }
  0x43   :  { %v144_v10 = vshll.u32 %v415_v4, 30  ;;  %v424_v13 = vmul.u32.u64.low %v232_v59, %v231_v12  ;;  %v425_v14 = vmul.u32.u64.high %v232_v59, %v231_v12, %v424_v13  ;;  %v239_v20 = vmul.u32 %v232_v59, %v223_v11 }
  0x44   :  { %v50_v21 = vcvt.s32.f32 %v46_v9  ;;  %v242_v27 = vadd.s32 1, %v428_v16  ;;  %v53_v22 = vmul.f32 1.5258789e-05, %v51_v17  ;;  %v137_v36 = vadd.s32 %v400_v29, %v405_v32 }
  0x45   :  { %v145_v18 = vsub.s32 %v141_v56, %v144_v10  ;;  %vm241_vm11 = vc.u32 %v425_v14, %v427_v15  ;;  %v240_v60 = vadd.s32 %v427_v15, %v425_v14  ;;  %v167_v62 = vsub.s32 4, %v415_v4 }
  0x46   :  { %v243_v24 = vsel %vm241_vm11, %v242_v27, %v428_v16  ;;  %v52_v30 = vadd.f32 1.0, %v50_v21  ;;  %331 = vlog2.f32 %v53_v22  ;;  %vm173_vm7 = vweird.f32 %v386_v34 }
  0x47   :  { %v147_v19 = vsub.s32 0, %v145_v18  ;;  %v244_v28 = vadd.s32 %v243_v24, %v239_v20  ;;  %v168_v11 = vsel %vm83_vm13, %v167_v62, %v415_v4 }
  0x48   :  { %v54_v38 = vmul.f32 1.5258789e-05, %v52_v30  ;;  %v170_v15 = vsel %vm441_vm14, 0, %v168_v11 }
  0x49   :  { %v308_v23 = vmin.u32 %v147_v19, %v145_v18  ;;  %v245_v33 = vadd.s32 536870912, %v244_v28 }
  0x4a   :  { %333 = vlog2.f32 %v54_v38 }
  0x4b   :  { %v149_v25 = vclz %v308_v23  ;;  %v435_v37 = vshrl.u32 %v245_v33, 30 }
  0x4d   :  { %v309_v31 = vadd.s32 4294967294, %v149_v25  ;;  %v247_v44 = vshll.u32 %v435_v37, 30  ;;  %v270_v21 = vsub.s32 4, %v435_v37 }
  0x4f   :  { %vm310_vm12 = vcmp.lt.s32.totalorder %v309_v31, 0  ;;  %v248_v47 = vsub.s32 %v244_v28, %v247_v44  ;;  %v271_v30 = vsel %vm186_vm0, %v270_v21, %v435_v37 }
  0x50   :  { %v152_v39 = vsel %vm310_vm12, 0, %v309_v31  ;;  %v332_v53 = vpop.eup %331 }
  0x51   :  { %v153_v40 = vsub.s32 32, %v152_v39  ;;  %v154_v42 = vshll.u32 %v145_v18, %v152_v39  ;;  %v157_v43 = vsub.s32 4294967266, %v152_v39  ;;  %v250_v52 = vsub.s32 0, %v248_v47 }
  0x52   :  { %v60_v56 = vmul.f32 0.6931472, %v332_v53  ;;  %v174_v18 = vand.u32 3, %v170_v15 }
  0x53   :  { %v155_v45 = vshrl.u32 %v137_v36, %v153_v40  ;;  %v158_v46 = vadd.s32 127, %v157_v43  ;;  %v312_v32 = vmin.u32 %v250_v52, %v248_v47  ;;  %v273_v36 = vsel %vm460_vm1, 0, %v271_v30 }
  0x54   :  { %v334_v61 = vpop.eup %333  ;;  %v63_v63 = vmul.f32 -2.0, %v60_v56  ;;  %vm176_vm2 = vcmp.eq.s32.totalorder %v174_v18, 0  ;;  %vm179_vm3 = vcmp.eq.s32.totalorder %v174_v18, 2  ;;  %vm175_vm5 = vcmp.lt.s32.totalorder %v174_v18, 2 }
  0x55   :  { %v156_v48 = vor.u32 %v155_v45, %v154_v42  ;;  %v159_v50 = vshll.u32 %v158_v46, 23  ;;  %v252_v55 = vclz %v312_v32  ;;  %v62_v5 = vmul.f32 0.6931472, %v334_v61 }
  0x56   :  { %vm67_vm4 = vcmp.eq.f32.partialorder %v63_v63, inf  ;;  %v70_v39 = vand.u32 2147483648, %v63_v63  ;;  %vm69_vm6 = vcmp.eq.f32.partialorder %v63_v63, 0.0  ;;  %v277_v43 = vand.u32 3, %v273_v36 }
  0x57   :  { %v160_v51 = vor.u32 4788187, %v159_v50  ;;  %v163_v29 = vcvt.s32.f32 %v156_v48  ;;  %v313_v58 = vadd.s32 4294967294, %v252_v55  ;;  %v64_v12 = vmul.f32 -2.0, %v62_v5  ;;  %v289_v55 = vld [vmem:[%s487_s1] sm:$0xff] }
  0x58   :  { %vm282_vm10 = vcmp.eq.s32.totalorder %v277_v43, 2  ;;  %vm279_vm11 = vcmp.eq.s32.totalorder %v277_v43, 0  ;;  %vm278_vm12 = vcmp.lt.s32.totalorder %v277_v43, 2 }
  0x59   :  { %v161_v54 = vand.u32 2147483647, %v160_v51  ;;  %vm314_vm15 = vcmp.lt.s32.totalorder %v313_v58, 0  ;;  %vm74_vm8 = vcmp.eq.f32.partialorder %v64_v12, inf  ;;  %vm76_vm9 = vcmp.eq.f32.partialorder %v64_v12, 0.0 }
  0x5a   :  { %v255_v0 = vsel %vm314_vm15, 0, %v313_v58 }
  0x5b   :  { %v164_v57 = vmul.f32 %v163_v29, %v161_v54  ;;  %v256_v2 = vsub.s32 32, %v255_v0  ;;  %v257_v3 = vshll.u32 %v248_v47, %v255_v0  ;;  %v260_v49 = vsub.s32 4294967266, %v255_v0 }
  0x5c   :  { %v77_v47 = vand.u32 2147483648, %v64_v12 }
  0x5d   :  { %v165_v26 = vxor.u32 2147483648, %v164_v57  ;;  %v258_v6 = vshrl.u32 %v240_v60, %v256_v2  ;;  %v261_v7 = vadd.s32 127, %v260_v49  ;;  %v290_v60 = vld [vmem:[%s487_s1 + $0x8] sm:$0xff] }
  0x5f   :  { %v166_v1 = vsel %vm83_vm13, %v165_v26, %v164_v57  ;;  %v259_v9 = vor.u32 %v258_v6, %v257_v3  ;;  %v262_v10 = vshll.u32 %v261_v7, 23  ;;  %vm276_vm13 = vweird.f32 %v388_v35 }
  0x60   :  { %v169_v41 = vsel %vm441_vm14, %v386_v34, %v166_v1 }
  0x61   :  { %335 = vcosq.f32 %v169_v41  ;;  %v263_v13 = vor.u32 4788187, %v262_v10  ;;  %v266_v14 = vcvt.s32.f32 %v259_v9 }
  0x62   :  { %337 = vsinq.f32 %v169_v41 }
  0x63   :  { %339 = vrsqrt.f32 %v63_v63  ;;  %v264_v16 = vand.u32 2147483647, %v263_v13 }
  0x64   :  { %341 = vrsqrt.f32 %v64_v12 }
  0x65   :  { %v267_v17 = vmul.f32 %v266_v14, %v264_v16 }
  0x67   :  { %v268_v4 = vxor.u32 2147483648, %v267_v17 }
  0x69   :  { %v269_v25 = vsel %vm186_vm0, %v268_v4, %v267_v17 }
  0x6a   :  { %v272_v28 = vsel %vm460_vm1, %v388_v35, %v269_v25 }
  0x6b   :  { %v336_v19 = vpop.eup %335  ;;  %343 = vcosq.f32 %v272_v28 }
  0x6c   :  { %v338_v27 = vpop.eup %337  ;;  %v180_v24 = vxor.u32 2147483648, %v336_v19  ;;  %345 = vsinq.f32 %v272_v28 }
  0x6d   :  { %v340_v22 = vpop.eup %339  ;;  %v177_v23 = vxor.u32 2147483648, %v338_v27 }
  0x6e   :  { %v66_v8 = vmul.f32 %v340_v22, %v63_v63  ;;  %v181_v33 = vsel %vm179_vm3, %v180_v24, %v338_v27  ;;  %v342_v38 = vpop.eup %341 }
  0x6f   :  { %v178_v31 = vsel %vm176_vm2, %v336_v19, %v177_v23  ;;  %v73_v44 = vmul.f32 %v342_v38, %v64_v12 }
  0x70   :  { %v68_v40 = vsel %vm67_vm4, %v63_v63, %v66_v8  ;;  %v182_v42 = vsel %vm175_vm5, %v178_v31, %v181_v33 }
  0x71   :  { %v71_v37 = vsel %vm69_vm6, %v70_v39, %v68_v40  ;;  %v183_v45 = vsel %vm173_vm7, nan, %v182_v42  ;;  %v75_v50 = vsel %vm74_vm8, %v64_v12, %v73_v44 }
  0x72   :  { %v287_v53 = vmul.f32 %v183_v45, %v71_v37  ;;  %v78_v32 = vsel %vm76_vm9, %v77_v47, %v75_v50 }
  0x75   :  { %v344_v46 = vpop.eup %343 }
  0x76   :  { %v346_v48 = vpop.eup %345  ;;  %v283_v52 = vxor.u32 2147483648, %v344_v46 }
  0x77   :  { %v280_v51 = vxor.u32 2147483648, %v346_v48 }
  0x78   :  { %v284_v34 = vsel %vm282_vm10, %v283_v52, %v346_v48 }
  0x79   :  { %v281_v54 = vsel %vm279_vm11, %v344_v46, %v280_v51 }
  0x7a   :  { %v285_v56 = vsel %vm278_vm12, %v281_v54, %v284_v34 }
  0x7b   :  { %v286_v58 = vsel %vm276_vm13, nan, %v285_v56 }
  0x7c   :  { %v288_v59 = vmul.f32 %v286_v58, %v78_v32 }
  0x81   :  { %v295_v29 = vpop.permute.xlu0 %294 }
  0x82   :  { %v297_v57 = vmul.f32 %v295_v29, %v287_v53  ;;  %v298_v61 = vmul.f32 %v295_v29, %v288_v59 }
  0x84   :  { %v299_v26 = vadd.f32 %v297_v57, %v289_v55  ;;  %v300_v35 = vadd.f32 %v298_v61, %v290_v60 }
  0x86   :  { %301 = vst [vmem:[%s488_s3] sm:$0xff] %v299_v26  ;;  %302 = vst [vmem:[%s488_s3 + $0x8] sm:$0xff] %v300_v35 }

</bundles_post_ra>
